<compile_context>
chip_gen: v6e
topology: v6e:2x2x1
jax: 0.10.0
libtpu: 0.0.40
codegen_flags: <defaults>
</compile_context>

<pallas_src>
import jax
import jax.numpy as jnp
from jax.experimental import pallas as pl
from jax.experimental.pallas import tpu as pltpu

LANE = 128       # TPU lane width (batch rides this axis)
TB_MAX = 2048    # max batch columns per tile


def _round_up(x, m):
    return ((x + m - 1) // m) * m


def _actor_critic_kernel(obsT_ref, mask_ref,
                         w1_ref, b1_ref, w2_ref, b2_ref, wh_ref, bh_ref,
                         out_ref):
    """Transposed dataflow: batch rides the 128-lane axis.

    obsT_ref : (obs_size, TB)   bf16
    mask_ref : (1, TB)          int32  packed bitmask (bit r => keep head-row r)
    out_ref  : (HEAD_ROWS, TB)  f32    rows [0:A] masked logits, row A value
    """
    f32 = jnp.float32
    bf16 = jnp.bfloat16

    # Shared trunk: bf16 MXU matmuls, f32 accumulation, f32 bias/tanh (v5e-safe).
    h1 = jnp.tanh(
        jnp.dot(w1_ref[...], obsT_ref[...], preferred_element_type=f32)
        + b1_ref[...])                                         # (256, TB) f32
    h2 = jnp.tanh(
        jnp.dot(w2_ref[...], h1.astype(bf16), preferred_element_type=f32)
        + b2_ref[...])                                         # (128, TB) f32

    # Fused actor|critic head: one small matmul, lane-dense (HEAD_ROWS, TB).
    heads = (jnp.dot(wh_ref[...], h2.astype(bf16), preferred_element_type=f32)
             + bh_ref[...])

    # Expand the per-column packed bitmask along the head-row (sublane) axis.
    row = jax.lax.broadcasted_iota(jnp.int32, heads.shape, 0)  # (HEAD_ROWS, TB)
    keep = (mask_ref[...] >> row) & 1
    out_ref[...] = jnp.where(keep > 0, heads, f32(-1e9))


def prepare_params(params):
    """One-time packing of weights into kernel layout (hoisted off the hot path).

    Linear weights are stored transposed for y^T = W x^T; actor/critic heads are
    fused into a single (HEAD_ROWS, 128) bf16 matrix (rows [0:A] actor, row A
    critic, remaining rows zero-padded).
    """
    bf16 = jnp.bfloat16
    hidden = params["wa"].shape[0]          # 128
    A = params["wa"].shape[1]
    head_rows = _round_up(A + 1, 8)
    assert head_rows < 32, "packed bitmask uses int32 lanes"

    whT = (jnp.zeros((head_rows, hidden), jnp.float32)
           .at[:A, :].set(params["wa"].T)
           .at[A, :].set(params["wc"][:, 0]))
    bhT = (jnp.zeros((head_rows, 1), jnp.float32)
           .at[:A, 0].set(params["ba"][0])
           .at[A, 0].set(params["bc"][0, 0]))

    return {
        "w1T": params["w1"].T.astype(bf16),   # (256, obs_size)
        "b1T": params["b1"].T,                # (256, 1) f32
        "w2T": params["w2"].T.astype(bf16),   # (128, 256)
        "b2T": params["b2"].T,                # (128, 1) f32
        "whT": whT.astype(bf16),              # (head_rows, 128)
        "bhT": bhT,                           # (head_rows, 1) f32
    }


@jax.jit
def actor_critic_forward(obs, prep, valid_actions_mask):
    """Returns (masked_logits, value) exactly like the PyTorch forward."""
    B, obs_size = obs.shape
    A = valid_actions_mask.shape[1]
    head_rows = prep["whT"].shape[0]
    assert A + 1 <= head_rows

    # --- batch tiling: batch on the lane axis, minimal tail padding ------
    b_lanes = _round_up(max(B, 1), LANE)
    n_tiles = pl.cdiv(b_lanes, TB_MAX)
    if n_tiles == 1 and b_lanes >= 2 * LANE:
        n_tiles = 2                       # feed both v7x TensorCores
    TB = _round_up(pl.cdiv(b_lanes, n_tiles), LANE)
    B_pad = n_tiles * TB

    # --- per-call input packing (tiny: 16 B obs + 4 B mask per row) ------
    obsT = jnp.zeros((obs_size, B_pad), jnp.bfloat16).at[:, :B].set(
        obs.T.astype(jnp.bfloat16))
    bits = jnp.sum(valid_actions_mask.astype(jnp.int32)
                   << jnp.arange(A, dtype=jnp.int32)[None, :], axis=1)
    # value / pad head-rows always pass through; padded batch columns stay 0.
    bits = bits | jnp.int32((1 << head_rows) - (1 << A))
    maskp = jnp.zeros((1, B_pad), jnp.int32).at[0, :B].set(bits)

    stream = lambda d: pl.BlockSpec((d, TB), lambda i: (0, i))
    const = lambda s: pl.BlockSpec(s, lambda i: (0, 0))

    out = pl.pallas_call(
        _actor_critic_kernel,
        grid=(n_tiles,),
        out_shape=jax.ShapeDtypeStruct((head_rows, B_pad), jnp.float32),
        in_specs=[
            stream(obs_size),                 # obs^T   (streamed, bf16)
            stream(1),                        # bitmask (streamed, int32)
            const(prep["w1T"].shape),         # weights stay VMEM-resident
            const(prep["b1T"].shape),
            const(prep["w2T"].shape),
            const(prep["b2T"].shape),
            const(prep["whT"].shape),
            const(prep["bhT"].shape),
        ],
        out_specs=stream(head_rows),          # (head_rows, TB) f32 slab
        compiler_params=pltpu.CompilerParams(
            dimension_semantics=("parallel",)),
    )(obsT, maskp, prep["w1T"], prep["b1T"], prep["w2T"], prep["b2T"],
      prep["whT"], prep["bhT"])

    logits = out[:A, :B].T                    # (B, A)
    value = out[A:A + 1, :B].T                # (B, 1)
    # TODO(synk): Categorical(logits=...) sampling / log_prob is host-side glue
    # (jax.nn.log_softmax + jax.random.categorical), not a kernel op.
    return logits, value


def init_params(key, obs_size, action_size):
    """Deterministic synthetic init matching nn.Linear shapes
    (stored transposed: (in, out))."""
    ks = jax.random.split(key, 8)

    def lin(kw, kb, fan_in, fan_out):
        bound = 1.0 / jnp.sqrt(jnp.float32(fan_in))
        w = jax.random.uniform(kw, (fan_in, fan_out), jnp.float32, -bound, bound)
        b = jax.random.uniform(kb, (1, fan_out), jnp.float32, -bound, bound)
        return w, b

    w1, b1 = lin(ks[0], ks[1], obs_size, 256)
    w2, b2 = lin(ks[2], ks[3], 256, 128)
    wa, ba = lin(ks[4], ks[5], 128, action_size)
    wc, bc = lin(ks[6], ks[7], 128, 1)
    return {"w1": w1, "b1": b1, "w2": w2, "b2": b2,
            "wa": wa, "ba": ba, "wc": wc, "bc": bc}


def _reference_forward(obs, params, mask):
    """Pure-JAX reference mirroring the kernel's bf16-matmul / f32-accumulate
    numerics (PyTorch f32 reference differs by ~1e-2 relative)."""
    bf16 = jnp.bfloat16
    h = jnp.tanh(jnp.dot(obs.astype(bf16), params["w1"].astype(bf16),
                         preferred_element_type=jnp.float32) + params["b1"])
    h = jnp.tanh(jnp.dot(h.astype(bf16), params["w2"].astype(bf16),
                         preferred_element_type=jnp.float32) + params["b2"])
    logits = jnp.dot(h.astype(bf16), params["wa"].astype(bf16),
                     preferred_element_type=jnp.float32) + params["ba"]
    logits = jnp.where(mask, logits, -1e9)
    value = jnp.dot(h.astype(bf16), params["wc"].astype(bf16),
                    preferred_element_type=jnp.float32) + params["bc"]
    return logits, value


if __name__ == "__main__":
    OBS_SIZE = 8       # matches the 8 FEATURE_LABELS
    ACTION_SIZE = 5
    BATCH = 2

    key = jax.random.PRNGKey(0)
    k_obs, k_params = jax.random.split(key)

    obs = jax.random.normal(k_obs, (BATCH, OBS_SIZE), jnp.float32)
    params = init_params(k_params, OBS_SIZE, ACTION_SIZE)
    prep = prepare_params(params)          # one-time weight packing / bf16 cast
    # Make some actions invalid to exercise the mask path.
    valid_actions_mask = jnp.array(
        [[True, True, False, True, True],
         [True, False, True, True, False]], dtype=jnp.bool_)

    logits, value = actor_critic_forward(obs, prep, valid_actions_mask)
    jax.block_until_ready((logits, value))

    # Correctness check against a pure-JAX reference of the PyTorch math.
    ref_logits, ref_value = _reference_forward(obs, params, valid_actions_mask)
    assert logits.shape == (BATCH, ACTION_SIZE)
    assert value.shape == (BATCH, 1)
    assert jnp.allclose(logits, ref_logits, atol=1e-3, rtol=1e-3)
    assert jnp.allclose(value, ref_value, atol=1e-3, rtol=1e-3)

    print("KERNEL_OK")
</pallas_src>

<mosaic_0001>
module attributes {stable_mosaic.version = 11 : i64} {
  func.func @_actor_critic_kernel(%arg0: i32, %arg1: memref<8x128xbf16, #tpu.memory_space<vmem>>, %arg2: memref<1x128xi32, #tpu.memory_space<vmem>>, %arg3: memref<256x8xbf16, #tpu.memory_space<vmem>>, %arg4: memref<256x1xf32, #tpu.memory_space<vmem>>, %arg5: memref<128x256xbf16, #tpu.memory_space<vmem>>, %arg6: memref<128x1xf32, #tpu.memory_space<vmem>>, %arg7: memref<8x128xbf16, #tpu.memory_space<vmem>>, %arg8: memref<8x1xf32, #tpu.memory_space<vmem>>, %arg9: memref<8x128xf32, #tpu.memory_space<vmem>>) attributes {dimension_semantics = [#tpu.dimension_semantics<parallel>], iteration_bounds = array<i64: 1>, scalar_prefetch = 0 : i64, scratch_operands = 0 : i64, tpu.core_type = #tpu.core_type<tc>, window_params = [{transform_indices = @transform_0, window_bounds = array<i64: 8, 128>}, {transform_indices = @transform_1, window_bounds = array<i64: 1, 128>}, {pipeline_mode = #tpu.pipeline_mode<synchronous>, transform_indices = @transform_2, window_bounds = array<i64: 256, 8>}, {pipeline_mode = #tpu.pipeline_mode<synchronous>, transform_indices = @transform_3, window_bounds = array<i64: 256, 1>}, {pipeline_mode = #tpu.pipeline_mode<synchronous>, transform_indices = @transform_4, window_bounds = array<i64: 128, 256>}, {pipeline_mode = #tpu.pipeline_mode<synchronous>, transform_indices = @transform_5, window_bounds = array<i64: 128, 1>}, {pipeline_mode = #tpu.pipeline_mode<synchronous>, transform_indices = @transform_6, window_bounds = array<i64: 8, 128>}, {pipeline_mode = #tpu.pipeline_mode<synchronous>, transform_indices = @transform_7, window_bounds = array<i64: 8, 1>}, {transform_indices = @transform_8, window_bounds = array<i64: 8, 128>}]} {
    %c0 = arith.constant 0 : index
    %c0_0 = arith.constant 0 : index
    %0 = vector.load %arg3[%c0, %c0_0] : memref<256x8xbf16, #tpu.memory_space<vmem>>, vector<256x8xbf16>
    %c0_1 = arith.constant 0 : index
    %c0_2 = arith.constant 0 : index
    %1 = vector.load %arg1[%c0_1, %c0_2] : memref<8x128xbf16, #tpu.memory_space<vmem>>, vector<8x128xbf16>
    %cst = arith.constant dense<0.000000e+00> : vector<256x128xf32>
    %2 = tpu.matmul %0, %1, %cst {dimension_numbers = #tpu.dot_dimension_numbers<[1], [0], [0], [1], [0, 0, 1, 1], [], []>} : vector<256x8xbf16>, vector<8x128xbf16>, vector<256x128xf32> -> vector<256x128xf32>
    %c0_3 = arith.constant 0 : index
    %c0_4 = arith.constant 0 : index
    %3 = vector.load %arg4[%c0_3, %c0_4] : memref<256x1xf32, #tpu.memory_space<vmem>>, vector<256x1xf32>
    %4 = vector.broadcast %3 : vector<256x1xf32> to vector<256x128xf32>
    %5 = arith.addf %2, %4 : vector<256x128xf32>
    %6 = math.tanh %5 : vector<256x128xf32>
    %c0_5 = arith.constant 0 : index
    %c0_6 = arith.constant 0 : index
    %7 = vector.load %arg5[%c0_5, %c0_6] : memref<128x256xbf16, #tpu.memory_space<vmem>>, vector<128x256xbf16>
    %8 = arith.truncf %6 : vector<256x128xf32> to vector<256x128xbf16>
    %cst_7 = arith.constant dense<0.000000e+00> : vector<128x128xf32>
    %9 = tpu.matmul %7, %8, %cst_7 {dimension_numbers = #tpu.dot_dimension_numbers<[1], [0], [0], [1], [0, 0, 1, 1], [], []>} : vector<128x256xbf16>, vector<256x128xbf16>, vector<128x128xf32> -> vector<128x128xf32>
    %c0_8 = arith.constant 0 : index
    %c0_9 = arith.constant 0 : index
    %10 = vector.load %arg6[%c0_8, %c0_9] : memref<128x1xf32, #tpu.memory_space<vmem>>, vector<128x1xf32>
    %11 = vector.broadcast %10 : vector<128x1xf32> to vector<128x128xf32>
    %12 = arith.addf %9, %11 : vector<128x128xf32>
    %13 = math.tanh %12 : vector<128x128xf32>
    %c0_10 = arith.constant 0 : index
    %c0_11 = arith.constant 0 : index
    %14 = vector.load %arg7[%c0_10, %c0_11] : memref<8x128xbf16, #tpu.memory_space<vmem>>, vector<8x128xbf16>
    %15 = arith.truncf %13 : vector<128x128xf32> to vector<128x128xbf16>
    %cst_12 = arith.constant dense<0.000000e+00> : vector<8x128xf32>
    %16 = tpu.matmul %14, %15, %cst_12 {dimension_numbers = #tpu.dot_dimension_numbers<[1], [0], [0], [1], [0, 0, 1, 1], [], []>} : vector<8x128xbf16>, vector<128x128xbf16>, vector<8x128xf32> -> vector<8x128xf32>
    %c0_13 = arith.constant 0 : index
    %c0_14 = arith.constant 0 : index
    %17 = vector.load %arg8[%c0_13, %c0_14] : memref<8x1xf32, #tpu.memory_space<vmem>>, vector<8x1xf32>
    %18 = vector.broadcast %17 : vector<8x1xf32> to vector<8x128xf32>
    %19 = arith.addf %16, %18 : vector<8x128xf32>
    %20 = tpu.iota {dimensions = array<i32: 0>} : vector<8x128xi32>
    %c0_15 = arith.constant 0 : index
    %c0_16 = arith.constant 0 : index
    %21 = vector.load %arg2[%c0_15, %c0_16] : memref<1x128xi32, #tpu.memory_space<vmem>>, vector<1x128xi32>
    %22 = vector.broadcast %21 : vector<1x128xi32> to vector<8x128xi32>
    %23 = arith.shrsi %22, %20 : vector<8x128xi32>
    %c1_i32 = arith.constant 1 : i32
    %24 = vector.broadcast %c1_i32 : i32 to vector<8x128xi32>
    %25 = arith.andi %23, %24 : vector<8x128xi32>
    %c0_i32 = arith.constant 0 : i32
    %26 = vector.broadcast %c0_i32 : i32 to vector<8x128xi32>
    %27 = arith.cmpi sgt, %25, %26 : vector<8x128xi32>
    %cst_17 = arith.constant -1.000000e+09 : f32
    %28 = vector.broadcast %cst_17 : f32 to vector<8x128xf32>
    %29 = arith.select %27, %19, %28 : vector<8x128xi1>, vector<8x128xf32>
    %c0_18 = arith.constant 0 : index
    %c0_19 = arith.constant 0 : index
    %30 = vector.load %arg9[%c0_18, %c0_19] : memref<8x128xf32, #tpu.memory_space<vmem>>, vector<8x128xf32>
    tpu.vector_store %arg9[%c0_18, %c0_19], %29 {strides = array<i32>} : memref<8x128xf32, #tpu.memory_space<vmem>>, vector<8x128xf32>,
    return
  }
  func.func @transform_0(%arg0: i32) -> (i32, i32) {
    %c0_i32 = arith.constant 0 : i32
    %c0_i32_0 = arith.constant 0 : i32
    return %c0_i32, %arg0 : i32, i32
  }
  func.func @transform_1(%arg0: i32) -> (i32, i32) {
    %c0_i32 = arith.constant 0 : i32
    %c0_i32_0 = arith.constant 0 : i32
    return %c0_i32, %arg0 : i32, i32
  }
  func.func @transform_2(%arg0: i32) -> (i32, i32) {
    %c0_i32 = arith.constant 0 : i32
    %c0_i32_0 = arith.constant 0 : i32
    %c0_i32_1 = arith.constant 0 : i32
    return %c0_i32, %c0_i32_0 : i32, i32
  }
  func.func @transform_3(%arg0: i32) -> (i32, i32) {
    %c0_i32 = arith.constant 0 : i32
    %c0_i32_0 = arith.constant 0 : i32
    %c0_i32_1 = arith.constant 0 : i32
    return %c0_i32, %c0_i32_0 : i32, i32
  }
  func.func @transform_4(%arg0: i32) -> (i32, i32) {
    %c0_i32 = arith.constant 0 : i32
    %c0_i32_0 = arith.constant 0 : i32
    %c0_i32_1 = arith.constant 0 : i32
    return %c0_i32, %c0_i32_0 : i32, i32
  }
  func.func @transform_5(%arg0: i32) -> (i32, i32) {
    %c0_i32 = arith.constant 0 : i32
    %c0_i32_0 = arith.constant 0 : i32
    %c0_i32_1 = arith.constant 0 : i32
    return %c0_i32, %c0_i32_0 : i32, i32
  }
  func.func @transform_6(%arg0: i32) -> (i32, i32) {
    %c0_i32 = arith.constant 0 : i32
    %c0_i32_0 = arith.constant 0 : i32
    %c0_i32_1 = arith.constant 0 : i32
    return %c0_i32, %c0_i32_0 : i32, i32
  }
  func.func @transform_7(%arg0: i32) -> (i32, i32) {
    %c0_i32 = arith.constant 0 : i32
    %c0_i32_0 = arith.constant 0 : i32
    %c0_i32_1 = arith.constant 0 : i32
    return %c0_i32, %c0_i32_0 : i32, i32
  }
  func.func @transform_8(%arg0: i32) -> (i32, i32) {
    %c0_i32 = arith.constant 0 : i32
    %c0_i32_0 = arith.constant 0 : i32
    return %c0_i32, %arg0 : i32, i32
  }
}

</mosaic_0001>

<bundles_post_ra>
// kernel: actor_critic_forward.1
= control target key start
LH: loop header
LB: loop body
LE: loop exit
PB: predicated region body
PF: predicated region fallthrough
CT: control target
= control target key end

     0   :  { %vm384_vm0 = vcmask 1043456   ;;  %vm335_vm1 = vcmask 64512   ;;  %v1308_v1 = vmov 0   ;;  %vm1310_vm2 = vmmov 0   ;;  %s1813_s0 = inlined_call_operand.vmem [shape: bf16[8,128], index: 0, kind: input, shape index: {}]   ;;  %s1814_s2 = inlined_call_operand.vmem [shape: bf16[256,8], index: 2, kind: input, shape index: {}]   ;;  %s1815_s3 = inlined_call_operand.vmem [shape: f32[256,1], index: 3, kind: input, shape index: {}]   ;;  %s1816_s5 = inlined_call_operand.vmem [shape: f32[128,1], index: 5, kind: input, shape index: {}]   ;;  %s1817_s7 = inlined_call_operand.vmem [shape: f32[8,1], index: 7, kind: input, shape index: {}]   ;;  %s1818_s4 = inlined_call_operand.vmem [shape: bf16[128,256], index: 4, kind: input, shape index: {}]   ;;  %s1819_s6 = inlined_call_operand.vmem [shape: bf16[8,128], index: 6, kind: input, shape index: {}]   ;;  %s1820_s1 = inlined_call_operand.vmem [shape: s32[1,128], index: 1, kind: input, shape index: {}]   ;;  %s1821_s8 = inlined_call_operand.vmem [shape: f32[8,128], index: 8, kind: output, shape index: {}]  }
   0x1   :  { %v62_v0 = vld [vmem:[%s1813_s0] sm:$0xf]  ;;  %1170 = vset.pattern.permute.xlu0 %v1308_v1  ;;  %1171 = vset.pattern.permute.xlu1 %v1308_v1  ;;  %v1173_v4 = vld [vmem:[%s1814_s2 + $0x8] sm:$0xff]   ;;  %v93_v5 = vld [vmem:[%s1815_s3 + $0xf0] sm:$0xff] }
   0x2   :  { %1166 = vmatprep.subr.msk.bf16.mxu0 %vm384_vm0, %v62_v0  ;;  %v386_v2 = vsel %vm384_vm0, %v62_v0, 0  ;;  %v1172_v3 = vld [vmem:[%s1814_s2] sm:$0xff]   ;;  %v94_v6 = vld [vmem:[%s1815_s3 + $0xf8] sm:$0xff]  ;;  %247 = vperm.xlu0 %1170, %v93_v5   ;;  %v77_v7 = vld [vmem:[%s1815_s3 + $0x70] sm:$0xff] }
   0x3   :  { %1113 = vmatpush3.bf16.msra.mxu0 %v386_v2  ;;  %1114 = vmatprep.mubr.msk.bf16.mxu0 %vm335_vm1, %v1172_v3  ;;  %v1174_v8 = vld [vmem:[%s1814_s2 + $0x10] sm:$0xff]   ;;  %v78_v9 = vld [vmem:[%s1815_s3 + $0x78] sm:$0xff]  ;;  %v91_v10 = vld [vmem:[%s1815_s3 + $0xe0] sm:$0xff] }
   0x4   :  { %167 = vperm.xlu1 %1171, %v77_v7   ;;  %v1175_v11 = vld [vmem:[%s1814_s2 + $0x18] sm:$0xff]   ;;  %v92_v12 = vld [vmem:[%s1815_s3 + $0xe8] sm:$0xff]  ;;  %v1176_v13 = vld [vmem:[%s1814_s2 + $0x20] sm:$0xff]  }
   0x5   :  { %v75_v14 = vld [vmem:[%s1815_s3 + $0x60] sm:$0xff]  ;;  %v76_v15 = vld [vmem:[%s1815_s3 + $0x68] sm:$0xff]  ;;  %v89_v17 = vld [vmem:[%s1815_s3 + $0xd0] sm:$0xff] }
   0x6   :  { %1115 = vmatmul.mubr.msk.bf16.vlgmr.msra.gmra.mxu0 %vm335_vm1, %v1173_v4  ;;  %252 = vperm.xlu0 %1170, %v94_v6   ;;  %v1177_v16 = vld [vmem:[%s1814_s2 + $0x28] sm:$0xff]   ;;  %v90_v18 = vld [vmem:[%s1815_s3 + $0xd8] sm:$0xff]  ;;  %v1178_v19 = vld [vmem:[%s1814_s2 + $0x30] sm:$0xff]  }
   0x7   :  { %1118 = vmatprep.mubr.msk.bf16.mxu0 %vm335_vm1, %v1174_v8  ;;  %v73_v20 = vld [vmem:[%s1815_s3 + $0x50] sm:$0xff]  ;;  %v74_v21 = vld [vmem:[%s1815_s3 + $0x58] sm:$0xff]  ;;  %v87_v22 = vld [vmem:[%s1815_s3 + $0xc0] sm:$0xff] }
   0x8   :  { %172 = vperm.xlu1 %1171, %v78_v9   ;;  %v1179_v23 = vld [vmem:[%s1814_s2 + $0x38] sm:$0xff]   ;;  %v88_v24 = vld [vmem:[%s1815_s3 + $0xc8] sm:$0xff]  ;;  %v1180_v25 = vld [vmem:[%s1814_s2 + $0x40] sm:$0xff]  }
   0x9   :  { %v71_v26 = vld [vmem:[%s1815_s3 + $0x40] sm:$0xff]  ;;  %v72_v27 = vld [vmem:[%s1815_s3 + $0x48] sm:$0xff]  ;;  %v85_v28 = vld [vmem:[%s1815_s3 + $0xb0] sm:$0xff] }
   0xa   :  { %237 = vperm.xlu0 %1170, %v91_v10   ;;  %v1181_v29 = vld [vmem:[%s1814_s2 + $0x48] sm:$0xff]   ;;  %v86_v30 = vld [vmem:[%s1815_s3 + $0xb8] sm:$0xff]  ;;  %v1182_v31 = vld [vmem:[%s1814_s2 + $0x50] sm:$0xff]  }
   0xb   :  { %v69_v32 = vld [vmem:[%s1815_s3 + $0x30] sm:$0xff]  ;;  %v70_v33 = vld [vmem:[%s1815_s3 + $0x38] sm:$0xff]  ;;  %v83_v34 = vld [vmem:[%s1815_s3 + $0xa0] sm:$0xff] }
   0xc   :  { %242 = vperm.xlu1 %1171, %v92_v12   ;;  %v1183_v35 = vld [vmem:[%s1814_s2 + $0x58] sm:$0xff]   ;;  %v84_v36 = vld [vmem:[%s1815_s3 + $0xa8] sm:$0xff]  ;;  %v1184_v37 = vld [vmem:[%s1814_s2 + $0x60] sm:$0xff]  }
   0xd   :  { %v67_v38 = vld [vmem:[%s1815_s3 + $0x20] sm:$0xff]  ;;  %v68_v39 = vld [vmem:[%s1815_s3 + $0x28] sm:$0xff]  ;;  %v81_v40 = vld [vmem:[%s1815_s3 + $0x90] sm:$0xff] }
   0xe   :  { %1119 = vmatmul.mubr.msk.bf16.gmra.mxu0 %vm335_vm1, %v1175_v11  ;;  %157 = vperm.xlu0 %1170, %v75_v14   ;;  %v1185_v41 = vld [vmem:[%s1814_s2 + $0x68] sm:$0xff]   ;;  %v82_v42 = vld [vmem:[%s1815_s3 + $0x98] sm:$0xff]  ;;  %v1186_v43 = vld [vmem:[%s1814_s2 + $0x70] sm:$0xff]  }
   0xf   :  { %1122 = vmatprep.mubr.msk.bf16.mxu0 %vm335_vm1, %v1176_v13  ;;  %v65_v44 = vld [vmem:[%s1815_s3 + $0x10] sm:$0xff]  ;;  %v66_v45 = vld [vmem:[%s1815_s3 + $0x18] sm:$0xff]  ;;  %v79_v46 = vld [vmem:[%s1815_s3 + $0x80] sm:$0xff] }
  0x10   :  { %162 = vperm.xlu1 %1171, %v76_v15   ;;  %v1187_v47 = vld [vmem:[%s1814_s2 + $0x78] sm:$0xff]   ;;  %v80_v48 = vld [vmem:[%s1815_s3 + $0x88] sm:$0xff]  ;;  %v63_v49 = vld [vmem:[%s1815_s3] sm:$0xff] }
  0x11   :  { %v64_v50 = vld [vmem:[%s1815_s3 + $0x8] sm:$0xff]  ;;  %v627_v51 = vld [vmem:[%s1816_s5 + $0x70] sm:$0xff]  ;;  %v628_v52 = vld [vmem:[%s1816_s5 + $0x78] sm:$0xff] }
  0x12   :  { %227 = vperm.xlu0 %1170, %v89_v17   ;;  %v625_v53 = vld [vmem:[%s1816_s5 + $0x60] sm:$0xff]  ;;  %v626_v54 = vld [vmem:[%s1816_s5 + $0x68] sm:$0xff]  ;;  %v623_v55 = vld [vmem:[%s1816_s5 + $0x50] sm:$0xff] }
  0x13   :  { %v624_v56 = vld [vmem:[%s1816_s5 + $0x58] sm:$0xff]  ;;  %v621_v57 = vld [vmem:[%s1816_s5 + $0x40] sm:$0xff]  ;;  %v622_v58 = vld [vmem:[%s1816_s5 + $0x48] sm:$0xff] }
  0x14   :  { %232 = vperm.xlu1 %1171, %v90_v18   ;;  %v619_v59 = vld [vmem:[%s1816_s5 + $0x30] sm:$0xff]  ;;  %v620_v60 = vld [vmem:[%s1816_s5 + $0x38] sm:$0xff]  ;;  %v617_v61 = vld [vmem:[%s1816_s5 + $0x20] sm:$0xff] }
  0x15   :  { %v618_v62 = vld [vmem:[%s1816_s5 + $0x28] sm:$0xff]  ;;  %v615_v63 = vld [vmem:[%s1816_s5 + $0x10] sm:$0xff]  ;;  %v616_v0 = vld [vmem:[%s1816_s5 + $0x18] sm:$0xff] }
  0x16   :  { %1123 = vmatmul.mubr.msk.bf16.gmra.mxu0 %vm335_vm1, %v1177_v16  ;;  %147 = vperm.xlu0 %1170, %v73_v20   ;;  %v613_v1 = vld [vmem:[%s1816_s5] sm:$0xff]  ;;  %v614_v2 = vld [vmem:[%s1816_s5 + $0x8] sm:$0xff] }
  0x17   :  { %1126 = vmatprep.mubr.msk.bf16.mxu0 %vm335_vm1, %v1178_v19  ;;  %v911_v3 = vld [vmem:[%s1817_s7] sm:$0xff] }
  0x18   :  { %152 = vperm.xlu1 %1171, %v74_v21  }
  0x1a   :  { %217 = vperm.xlu0 %1170, %v87_v22  }
  0x1c   :  { %222 = vperm.xlu1 %1171, %v88_v24  }
  0x1e   :  { %1127 = vmatmul.mubr.msk.bf16.gmra.mxu0 %vm335_vm1, %v1179_v23  ;;  %137 = vperm.xlu0 %1170, %v71_v26  }
  0x1f   :  { %1130 = vmatprep.mubr.msk.bf16.mxu0 %vm335_vm1, %v1180_v25 }
  0x20   :  { %142 = vperm.xlu1 %1171, %v72_v27   ;;  %v1190_v27 = vld [vmem:[%s1818_s4 + $0x4] ss:$8 sps:$4 sm:$0xff]  }
  0x21   :  { %821 = vmatprep.mubr.bf16.mxu1 %v1190_v27 }
  0x22   :  { %207 = vperm.xlu0 %1170, %v85_v28  }
  0x24   :  { %212 = vperm.xlu1 %1171, %v86_v30  }
  0x26   :  { %1131 = vmatmul.mubr.msk.bf16.gmra.mxu0 %vm335_vm1, %v1181_v29  ;;  %127 = vperm.xlu0 %1170, %v69_v32  }
  0x27   :  { %1134 = vmatprep.mubr.msk.bf16.mxu0 %vm335_vm1, %v1182_v31 }
  0x28   :  { %132 = vperm.xlu1 %1171, %v70_v33  }
  0x2a   :  { %197 = vperm.xlu0 %1170, %v83_v34  }
  0x2c   :  { %202 = vperm.xlu1 %1171, %v84_v36  }
  0x2e   :  { %1135 = vmatmul.mubr.msk.bf16.gmra.mxu0 %vm335_vm1, %v1183_v35  ;;  %117 = vperm.xlu0 %1170, %v67_v38  }
  0x2f   :  { %1138 = vmatprep.mubr.msk.bf16.mxu0 %vm335_vm1, %v1184_v37 }
  0x30   :  { %122 = vperm.xlu1 %1171, %v68_v39  }
  0x32   :  { %187 = vperm.xlu0 %1170, %v81_v40  }
  0x34   :  { %192 = vperm.xlu1 %1171, %v82_v42  }
  0x36   :  { %1139 = vmatmul.mubr.msk.bf16.gmra.mxu0 %vm335_vm1, %v1185_v41  ;;  %107 = vperm.xlu0 %1170, %v65_v44  }
  0x37   :  { %1142 = vmatprep.mubr.msk.bf16.mxu0 %vm335_vm1, %v1186_v43 }
  0x38   :  { %112 = vperm.xlu1 %1171, %v66_v45  }
  0x3a   :  { %177 = vperm.xlu0 %1170, %v79_v46  }
  0x3c   :  { %182 = vperm.xlu1 %1171, %v80_v48  }
  0x3e   :  { %1143 = vmatmul.mubr.msk.bf16.gmra.mxu0 %vm335_vm1, %v1187_v47  ;;  %97 = vperm.xlu0 %1170, %v63_v49  }
  0x40   :  { %102 = vperm.xlu1 %1171, %v64_v50  }
  0x42   :  { %701 = vperm.xlu0 %1170, %v627_v51  }
  0x44   :  { %706 = vperm.xlu1 %1171, %v628_v52  }
  0x46   :  { %691 = vperm.xlu0 %1170, %v625_v53  }
  0x48   :  { %696 = vperm.xlu1 %1171, %v626_v54  }
  0x4a   :  { %681 = vperm.xlu0 %1170, %v623_v55  }
  0x4c   :  { %686 = vperm.xlu1 %1171, %v624_v56  }
  0x4e   :  { %671 = vperm.xlu0 %1170, %v621_v57  }
  0x50   :  { %676 = vperm.xlu1 %1171, %v622_v58  }
  0x52   :  { %661 = vperm.xlu0 %1170, %v619_v59  }
  0x54   :  { %666 = vperm.xlu1 %1171, %v620_v60  }
  0x56   :  { %651 = vperm.xlu0 %1170, %v617_v61  }
  0x58   :  { %656 = vperm.xlu1 %1171, %v618_v62  }
  0x5a   :  { %641 = vperm.xlu0 %1170, %v615_v63  }
  0x5c   :  { %646 = vperm.xlu1 %1171, %v616_v0  }
  0x5e   :  { %631 = vperm.xlu0 %1170, %v613_v1  }
  0x60   :  { %636 = vperm.xlu1 %1171, %v614_v2  }
  0x62   :  { %914 = vperm.xlu0 %1170, %v911_v3  }
  0x7d   :  { %v1570_v4 = vpop.permute.xlu0 %247 }
  0x7f   :  { %v1572_v5 = vpop.permute.xlu1 %167 }
  0x81   :  { %v1574_v6 = vpop.permute.xlu0 %252 }
  0x83   :  { %v1576_v7 = vpop.permute.xlu1 %172 }
  0x85   :  { %v1578_v8 = vpop.permute.xlu0 %237 }
  0x87   :  { %v1580_v9 = vpop.permute.xlu1 %242 }
  0x89   :  { %v1582_v10 = vpop.permute.xlu0 %157 }
  0x8b   :  { %v1584_v11 = vpop.permute.xlu1 %162 }
  0x8d   :  { %v1586_v12 = vpop.permute.xlu0 %227 }
  0x8f   :  { %v1588_v13 = vpop.permute.xlu1 %232 }
  0x91   :  { %v1590_v14 = vpop.permute.xlu0 %147 }
  0x93   :  { %v1592_v15 = vpop.permute.xlu1 %152 }
  0x95   :  { %v1594_v16 = vpop.permute.xlu0 %217 }
  0x97   :  { %v1596_v17 = vpop.permute.xlu1 %222 }
  0x99   :  { %v1598_v18 = vpop.permute.xlu0 %137 }
  0x9b   :  { %v1600_v19 = vpop.permute.xlu1 %142 }
  0x9d   :  { %v1602_v20 = vpop.permute.xlu0 %207 }
  0x9f   :  { %v1604_v21 = vpop.permute.xlu1 %212 }
  0xa1   :  { %v128_v22 = vpop.permute.xlu0 %127 }
  0xa3   :  { %v133_v23 = vpop.permute.xlu1 %132 }
  0xa5   :  { %v1606_v24 = vpop.permute.xlu0 %197 }
  0xa7   :  { %v1608_v25 = vpop.permute.xlu1 %202 }
  0xa9   :  { %v118_v26 = vpop.permute.xlu0 %117 }
  0xab   :  { %v123_v28 = vpop.permute.xlu1 %122 }
  0xad   :  { %v1613_v29 = vpop.permute.xlu0 %187 }
  0xaf   :  { %v1615_v30 = vpop.permute.xlu1 %192 }
  0xb1   :  { %v108_v31 = vpop.permute.xlu0 %107 }
  0xb3   :  { %v113_v32 = vpop.permute.xlu1 %112 }
  0xb5   :  { %v1617_v33 = vpop.permute.xlu0 %177 }
  0xb7   :  { %v1619_v34 = vpop.permute.xlu1 %182 }
  0xb9   :  { %v98_v38 = vpop.permute.xlu0 %97 }
  0xbb   :  { %v103_v42 = vpop.permute.xlu1 %102 }
  0xc6   :  { %v1116_v35 = vpop.f32.mrf.mxu0 }
  0xc7   :  { %v431_v36 = vadd.f32 %v1116_v35, %v108_v31 }
  0xc8   :  { %v422_v37 = vpop.f32.mrf.mxu0 }
  0xc9   :  { %v423_v39 = vadd.f32 %v422_v37, %v98_v38  ;;  %1212 = vtanh.f32 %v431_v36 }
  0xca   :  { %v1117_v40 = vpop.f32.mrf.mxu0 }
  0xcb   :  { %v434_v41 = vadd.f32 %v1117_v40, %v113_v32 }
  0xcc   :  { %v425_v43 = vpop.f32.mrf.mxu0 }
  0xcd   :  { %1214 = vtanh.f32 %v434_v41  ;;  %v426_v44 = vadd.f32 %v425_v43, %v103_v42 }
  0xce   :  { %1216 = vtanh.f32 %v423_v39  ;;  %v1120_v45 = vpop.f32.mrf.mxu0 }
  0xcf   :  { %1218 = vtanh.f32 %v426_v44  ;;  %v447_v46 = vadd.f32 %v1120_v45, %v128_v22 }
  0xd0   :  { %v438_v47 = vpop.f32.mrf.mxu0 }
  0xd1   :  { %v439_v48 = vadd.f32 %v438_v47, %v118_v26  ;;  %1220 = vtanh.f32 %v447_v46 }
  0xd2   :  { %v1121_v49 = vpop.f32.mrf.mxu0 }
  0xd3   :  { %v450_v50 = vadd.f32 %v1121_v49, %v133_v23 }
  0xd4   :  { %v441_v51 = vpop.f32.mrf.mxu0 }
  0xd5   :  { %1222 = vtanh.f32 %v450_v50  ;;  %v442_v52 = vadd.f32 %v441_v51, %v123_v28 }
  0xd6   :  { %1224 = vtanh.f32 %v439_v48  ;;  %v1124_v53 = vpop.f32.mrf.mxu0  ;;  %v1623_v55 = vpop.eup %1212 }
  0xd7   :  { %1226 = vtanh.f32 %v442_v52 }
  0xd8   :  { %v1621_v54 = vpop.f32.mrf.mxu0 }
  0xda   :  { %v1625_v56 = vpop.eup %1214  ;;  %v1125_v57 = vpop.f32.mrf.mxu0 }
  0xdb   :  { %v1627_v58 = vpop.eup %1216 }
  0xdc   :  { %v1631_v60 = vpop.eup %1218  ;;  %v457_v61 = vpop.f32.mrf.mxu0 }
  0xde   :  { %v1128_v63 = vpop.f32.mrf.mxu0  ;;  %v1635_v1 = vpop.eup %1220 }
  0xdf   :  { %v479_v45 = vadd.f32 %v1128_v63, %v1572_v5 }
  0xe0   :  { %v470_v0 = vpop.f32.mrf.mxu0 }
  0xe1   :  { %1228 = vtanh.f32 %v479_v45 }
  0xe2   :  { %v1637_v2 = vpop.eup %1222  ;;  %v1129_v3 = vpop.f32.mrf.mxu0 }
  0xe3   :  { %v1639_v22 = vpop.eup %1224  ;;  %v600_v23 = vpack.c.bf16 %v1637_v2, %v1635_v1  ;;  %v482_v47 = vadd.f32 %v1129_v3, %v1576_v7  ;;  %v471_v7 = vadd.f32 %v470_v0, %v1582_v10  ;;  %v1188_v1 = vld [vmem:[%s1818_s4] ss:$8 sps:$4 sm:$0xff]   ;;  %v1824_v2 = vpack.c.bf16 %v1631_v60, %v1627_v58  ;;  %v1197_v60 = vld [vmem:[%s1818_s4 + $0x34] ss:$8 sps:$4 sm:$0xff]  }
  0xe4   :  { %v1643_v26 = vpop.eup %1226  ;;  %v473_v27 = vpop.f32.mrf.mxu0  ;;  %v1196_v58 = vld [vmem:[%s1818_s4 + $0x20] ss:$8 sps:$4 sm:$0xff]  }
  0xe5   :  { %1230 = vtanh.f32 %v482_v47  ;;  %v474_v62 = vadd.f32 %v473_v27, %v1584_v11  ;;  %v463_v11 = vadd.f32 %v1124_v53, %v1590_v14 }
  0xe6   :  { %v1647_v31 = vpop.f32.mrf.mxu0 }
  0xe8   :  { %v1649_v32 = vpop.f32.mrf.mxu0 }
  0xea   :  { %v1133_v35 = vpop.f32.mrf.mxu0 }
  0xec   :  { %v1651_v36 = vpop.f32.mrf.mxu0 }
  0xee   :  { %v1136_v37 = vpop.f32.mrf.mxu0 }
  0xf0   :  { %v502_v38 = vpop.f32.mrf.mxu0 }
  0xf2   :  { %v1137_v39 = vpop.f32.mrf.mxu0 }
  0xf3   :  { %v514_v10 = vadd.f32 %v1137_v39, %v1604_v21  ;;  %v503_v21 = vadd.f32 %v502_v38, %v1606_v24  ;;  %v487_v38 = vadd.f32 %v1649_v32, %v1617_v33 }
  0xf4   :  { %v505_v40 = vpop.f32.mrf.mxu0 }
  0xf6   :  { %v1140_v41 = vpop.f32.mrf.mxu0 }
  0xf8   :  { %v518_v42 = vpop.f32.mrf.mxu0 }
  0xfa   :  { %v1141_v43 = vpop.f32.mrf.mxu0 }
  0xfb   :  { %v530_v28 = vadd.f32 %v1141_v43, %v1588_v13  ;;  %v519_v13 = vadd.f32 %v518_v42, %v1594_v16  ;;  %v506_v16 = vadd.f32 %v505_v40, %v1608_v25  ;;  %v495_v25 = vadd.f32 %v1647_v31, %v1613_v29 }
  0xfc   :  { %v521_v44 = vpop.f32.mrf.mxu0 }
  0xfe   :  { %v1144_v46 = vpop.f32.mrf.mxu0 }
  0xff   :  { %v543_v48 = vadd.f32 %v1144_v46, %v1570_v4  ;;  %v527_v4 = vadd.f32 %v1140_v41, %v1586_v12  ;;  %v455_v12 = vadd.f32 %v1621_v54, %v1598_v18  ;;  %v498_v54 = vadd.f32 %v1133_v35, %v1615_v30 }
 0x100   :  { %v534_v49 = vpop.f32.mrf.mxu0 }
 0x101   :  { %v535_v50 = vadd.f32 %v534_v49, %v1578_v8  ;;  %1232 = vtanh.f32 %v543_v48  ;;  %v466_v8 = vadd.f32 %v1125_v57, %v1592_v15  ;;  %v1229_v15 = vpop.eup %1228  ;;  %v511_v57 = vadd.f32 %v1136_v37, %v1602_v20 }
 0x102   :  { %v1145_v51 = vpop.f32.mrf.mxu0  ;;  %v1822_v49 = vpack.c.bf16 %v1643_v26, %v1639_v22  ;;  %v1191_v22 = vld [vmem:[%s1818_s4 + $0x14] ss:$8 sps:$4 sm:$0xff]   ;;  %v1200_v26 = vld [vmem:[%s1818_s4 + $0x44] ss:$8 sps:$4 sm:$0xff]  }
 0x103   :  { %v546_v52 = vadd.f32 %v1145_v51, %v1574_v6  ;;  %v522_v6 = vadd.f32 %v521_v44, %v1596_v17  ;;  %v1231_v17 = vpop.eup %1230 }
 0x104   :  { %v537_v59 = vpop.f32.mrf.mxu0 }
 0x105   :  { %1234 = vtanh.f32 %v546_v52  ;;  %v538_v5 = vadd.f32 %v537_v59, %v1580_v9  ;;  %v458_v9 = vadd.f32 %v457_v61, %v1600_v19  ;;  %v1823_v52 = vpack.c.bf16 %v1625_v56, %v1623_v55  ;;  %v1193_v55 = vld [vmem:[%s1818_s4 + $0x10] ss:$8 sps:$4 sm:$0xff]   ;;  %v1194_v56 = vld [vmem:[%s1818_s4 + $0x24] ss:$8 sps:$4 sm:$0xff]  }
 0x106   :  { %1236 = vtanh.f32 %v535_v50 }
 0x107   :  { %1238 = vtanh.f32 %v538_v5  ;;  %v1202_v5 = vld [vmem:[%s1818_s4 + $0x40] ss:$8 sps:$4 sm:$0xff]  }
 0x108   :  { %1240 = vtanh.f32 %v474_v62  ;;  %v604_v62 = vpack.c.bf16 %v1231_v17, %v1229_v15 }
 0x109   :  { %1242 = vtanh.f32 %v530_v28  ;;  %v490_v28 = vadd.f32 %v1651_v36, %v1619_v34 }
 0x10a   :  { %1244 = vtanh.f32 %v471_v7  ;;  %v1203_v7 = vld [vmem:[%s1818_s4 + $0x54] ss:$8 sps:$4 sm:$0xff]  }
 0x10b   :  { %1246 = vtanh.f32 %v527_v4  ;;  %v1205_v4 = vld [vmem:[%s1818_s4 + $0x50] ss:$8 sps:$4 sm:$0xff]  }
 0x10c   :  { %1248 = vtanh.f32 %v466_v8  ;;  %v1206_v8 = vld [vmem:[%s1818_s4 + $0x64] ss:$8 sps:$4 sm:$0xff]  }
 0x10d   :  { %1250 = vtanh.f32 %v522_v6  ;;  %v1208_v6 = vld [vmem:[%s1818_s4 + $0x60] ss:$8 sps:$4 sm:$0xff]  }
 0x10e   :  { %1252 = vtanh.f32 %v463_v11  ;;  %v1233_v14 = vpop.eup %1232  ;;  %v1209_v11 = vld [vmem:[%s1818_s4 + $0x74] ss:$8 sps:$4 sm:$0xff]  }
 0x10f   :  { %1254 = vtanh.f32 %v519_v13  ;;  %v1211_v13 = vld [vmem:[%s1818_s4 + $0x70] ss:$8 sps:$4 sm:$0xff]  }
 0x110   :  { %1256 = vtanh.f32 %v458_v9  ;;  %v1309_v9 = vmov 0.0  }
 0x111   :  { %1258 = vtanh.f32 %v514_v10  ;;  %1146 = vmatprep.subr.bf16.mxu0 %v1309_v9  ;;  %v1739_v10 = vpop.permute.xlu0 %701  ;;  %1162 = vmatprep.mubr.msk.bf16.mxu0 %vm1310_vm2, %v1309_v9 }
 0x112   :  { %v1235_v53 = vpop.eup %1234  ;;  %1260 = vtanh.f32 %v455_v12  ;;  %v1741_v12 = vpop.permute.xlu1 %706 }
 0x113   :  { %v1237_v19 = vpop.eup %1236  ;;  %1262 = vtanh.f32 %v511_v57  ;;  %v612_v59 = vpack.c.bf16 %v1235_v53, %v1233_v14 }
 0x114   :  { %v1239_v61 = vpop.eup %1238  ;;  %1264 = vtanh.f32 %v506_v16 }
 0x115   :  { %v1241_v18 = vpop.eup %1240  ;;  %1039 = vmatprep.subr.bf16.mxu1 %v612_v59  ;;  %v611_v20 = vpack.c.bf16 %v1239_v61, %v1237_v19  ;;  %1266 = vtanh.f32 %v503_v21  ;;  %v1743_v15 = vpop.permute.xlu0 %691 }
 0x116   :  { %v1243_v63 = vpop.eup %1242  ;;  %1040 = vmatpush3.bf16.msra.mxu1 %v604_v62  ;;  %1268 = vtanh.f32 %v498_v54  ;;  %v1745_v57 = vpop.permute.xlu1 %696 }
 0x117   :  { %v1245_v0 = vpop.eup %1244  ;;  %1041 = vmatprep.subr.bf16.mxu1 %v611_v20  ;;  %1270 = vtanh.f32 %v495_v25 }
 0x118   :  { %v1247_v3 = vpop.eup %1246  ;;  %v603_v27 = vpack.c.bf16 %v1241_v18, %v1245_v0  ;;  %1272 = vtanh.f32 %v490_v28 }
 0x119   :  { %v1249_v24 = vpop.eup %1248  ;;  %v610_v37 = vpack.c.bf16 %v1243_v63, %v1247_v3  ;;  %1274 = vtanh.f32 %v487_v38  ;;  %v1747_v17 = vpop.permute.xlu0 %681 }
 0x11a   :  { %v1251_v30 = vpop.eup %1250  ;;  %1042 = vmatpush3.bf16.msra.mxu1 %v603_v27  ;;  %v1749_v14 = vpop.permute.xlu1 %686 }
 0x11b   :  { %v1253_v35 = vpop.eup %1252  ;;  %1043 = vmatprep.subr.bf16.mxu1 %v610_v37 }
 0x11c   :  { %v1255_v39 = vpop.eup %1254  ;;  %v602_v29 = vpack.c.bf16 %v1249_v24, %v1253_v35 }
 0x11d   :  { %v1257_v31 = vpop.eup %1256  ;;  %v609_v40 = vpack.c.bf16 %v1251_v30, %v1255_v39  ;;  %v1751_v16 = vpop.permute.xlu0 %671 }
 0x11e   :  { %v1259_v41 = vpop.eup %1258  ;;  %1044 = vmatpush3.bf16.msra.mxu1 %v602_v29  ;;  %v1753_v53 = vpop.permute.xlu1 %676 }
 0x11f   :  { %v1261_v42 = vpop.eup %1260  ;;  %1045 = vmatprep.subr.bf16.mxu1 %v609_v40 }
 0x120   :  { %v1263_v34 = vpop.eup %1262  ;;  %v601_v36 = vpack.c.bf16 %v1257_v31, %v1261_v42 }
 0x121   :  { %v608_v43 = vpack.c.bf16 %v1259_v41, %v1263_v34  ;;  %v1265_v44 = vpop.eup %1264  ;;  %v1756_v19 = vpop.permute.xlu0 %661 }
 0x122   :  { %1046 = vmatpush3.bf16.msra.mxu1 %v601_v36  ;;  %v1267_v45 = vpop.eup %1266  ;;  %v1758_v21 = vpop.permute.xlu1 %666 }
 0x123   :  { %1047 = vmatprep.subr.bf16.mxu1 %v608_v43  ;;  %v607_v46 = vpack.c.bf16 %v1265_v44, %v1267_v45  ;;  %v1269_v33 = vpop.eup %1268 }
 0x124   :  { %v1271_v32 = vpop.eup %1270 }
 0x125   :  { %v606_v47 = vpack.c.bf16 %v1269_v33, %v1271_v32  ;;  %v1273_v48 = vpop.eup %1272  ;;  %v1760_v59 = vpop.permute.xlu0 %651 }
 0x126   :  { %1048 = vmatpush3.bf16.msra.mxu1 %v600_v23  ;;  %v1275_v50 = vpop.eup %1274  ;;  %v1199_v23 = vld [vmem:[%s1818_s4 + $0x30] ss:$8 sps:$4 sm:$0xff]   ;;  %v1762_v61 = vpop.permute.xlu1 %656 }
 0x127   :  { %1049 = vmatprep.subr.bf16.mxu1 %v607_v46  ;;  %v605_v51 = vpack.c.bf16 %v1273_v48, %v1275_v50 }
 0x129   :  { %v642_v62 = vpop.permute.xlu0 %641 }
 0x12a   :  { %1050 = vmatpush3.bf16.msra.mxu1 %v1822_v49  ;;  %v647_v54 = vpop.permute.xlu1 %646 }
 0x12b   :  { %1051 = vmatprep.subr.bf16.mxu1 %v606_v47 }
 0x12d   :  { %v632_v25 = vpop.permute.xlu0 %631 }
 0x12e   :  { %1052 = vmatpush3.bf16.msra.mxu1 %v1823_v52  ;;  %v637_v28 = vpop.permute.xlu1 %636 }
 0x12f   :  { %1053 = vmatprep.subr.bf16.mxu1 %v605_v51 }
 0x132   :  { %1054 = vmatpush3.bf16.msra.mxu1 %v1824_v2 }
 0x135   :  { %822 = vmatmul.mubr.bf16.vlgmr.msra.gmra.mxu1 %v1188_v1 }
 0x136   :  { %829 = vmatprep.mubr.bf16.mxu1 %v1191_v22 }
 0x13d   :  { %830 = vmatmul.mubr.bf16.gmra.mxu1 %v1193_v55 }
 0x13e   :  { %837 = vmatprep.mubr.bf16.mxu1 %v1194_v56 }
 0x145   :  { %838 = vmatmul.mubr.bf16.gmra.mxu1 %v1196_v58 }
 0x146   :  { %845 = vmatprep.mubr.bf16.mxu1 %v1197_v60 }
 0x14d   :  { %846 = vmatmul.mubr.bf16.gmra.mxu1 %v1199_v23 }
 0x14e   :  { %853 = vmatprep.mubr.bf16.mxu1 %v1200_v26 }
 0x155   :  { %854 = vmatmul.mubr.bf16.gmra.mxu1 %v1202_v5 }
 0x156   :  { %861 = vmatprep.mubr.bf16.mxu1 %v1203_v7 }
 0x15d   :  { %862 = vmatmul.mubr.bf16.gmra.mxu1 %v1205_v4 }
 0x15e   :  { %869 = vmatprep.mubr.bf16.mxu1 %v1206_v8 }
 0x165   :  { %870 = vmatmul.mubr.bf16.gmra.mxu1 %v1208_v6 }
 0x166   :  { %877 = vmatprep.mubr.bf16.mxu1 %v1209_v11 }
 0x16d   :  { %878 = vmatmul.mubr.bf16.gmra.mxu1 %v1211_v13 }
 0x1f5   :  { %v1055_v18 = vpop.f32.mrf.mxu1 }
 0x1f7   :  { %v1056_v20 = vpop.f32.mrf.mxu1 }
 0x1f8   :  { %v1057_v63 = vadd.f32 %v1056_v20, %v1055_v18 }
 0x1f9   :  { %v1058_v0 = vpop.f32.mrf.mxu1 }
 0x1fa   :  { %v824_v3 = vadd.f32 %v1057_v63, %v632_v25 }
 0x1fb   :  { %v1059_v27 = vpop.f32.mrf.mxu1 }
 0x1fc   :  { %v1060_v24 = vadd.f32 %v1059_v27, %v1058_v0  ;;  %1276 = vtanh.f32 %v824_v3 }
 0x1fd   :  { %v1061_v37 = vpop.f32.mrf.mxu1 }
 0x1fe   :  { %v827_v30 = vadd.f32 %v1060_v24, %v637_v28 }
 0x1ff   :  { %v1062_v35 = vpop.f32.mrf.mxu1 }
 0x200   :  { %1278 = vtanh.f32 %v827_v30  ;;  %v1063_v38 = vadd.f32 %v1062_v35, %v1061_v37 }
 0x201   :  { %v1064_v39 = vpop.f32.mrf.mxu1 }
 0x202   :  { %v832_v29 = vadd.f32 %v1063_v38, %v642_v62 }
 0x203   :  { %v1065_v31 = vpop.f32.mrf.mxu1 }
 0x204   :  { %v1066_v40 = vadd.f32 %v1065_v31, %v1064_v39  ;;  %1280 = vtanh.f32 %v832_v29 }
 0x205   :  { %v1067_v41 = vpop.f32.mrf.mxu1 }
 0x206   :  { %v835_v42 = vadd.f32 %v1066_v40, %v647_v54 }
 0x207   :  { %v1068_v34 = vpop.f32.mrf.mxu1 }
 0x208   :  { %1282 = vtanh.f32 %v835_v42  ;;  %v1764_v36 = vadd.f32 %v1068_v34, %v1067_v41 }
 0x209   :  { %v1070_v43 = vpop.f32.mrf.mxu1  ;;  %v1766_v45 = vpop.eup %1276 }
 0x20b   :  { %v1071_v44 = vpop.f32.mrf.mxu1 }
 0x20c   :  { %v1072_v39 = vadd.f32 %v1071_v44, %v1070_v43 }
 0x20d   :  { %v1768_v46 = vpop.eup %1278  ;;  %v1073_v33 = vpop.f32.mrf.mxu1 }
 0x20e   :  { %v903_v32 = vpack.c.bf16 %v1768_v46, %v1766_v45 }
 0x20f   :  { %v1074_v47 = vpop.f32.mrf.mxu1 }
 0x211   :  { %v1076_v48 = vpop.f32.mrf.mxu1  ;;  %v1772_v50 = vpop.eup %1280 }
 0x213   :  { %v1077_v49 = vpop.f32.mrf.mxu1 }
 0x214   :  { %v1078_v35 = vadd.f32 %v1077_v49, %v1076_v48 }
 0x215   :  { %v1774_v51 = vpop.eup %1282  ;;  %v1079_v52 = vpop.f32.mrf.mxu1 }
 0x216   :  { %v904_v1 = vpack.c.bf16 %v1774_v51, %v1772_v50  ;;  %v915_v51 = vpop.permute.xlu0 %914 }
 0x217   :  { %v1080_v2 = vpop.f32.mrf.mxu1 }
 0x218   :  { %v1081_v30 = vadd.f32 %v1080_v2, %v1079_v52  ;;  %v902_v52 = vld [vmem:[%s1819_s6] sm:$0xf]  ;;  %v957_v2 = vlaneseq }
 0x219   :  { %v1082_v22 = vpop.f32.mrf.mxu1 }
 0x21b   :  { %v1083_v55 = vpop.f32.mrf.mxu1 }
 0x21c   :  { %v1084_v28 = vadd.f32 %v1083_v55, %v1082_v22  ;;  %v958_v22 = vshrl.u32 %v957_v2, 7  ;;  %v1021_v55 = vld [vmem:[%s1820_s1] ss:$0 sm:$0xff] }
 0x21d   :  { %v1085_v56 = vpop.f32.mrf.mxu1 }
 0x21e   :  { %v859_v38 = vadd.f32 %v1084_v28, %v1753_v53  ;;  %v840_v53 = vadd.f32 %v1764_v36, %v1760_v59 }
 0x21f   :  { %v1086_v58 = vpop.f32.mrf.mxu1 }
 0x220   :  { %v1087_v27 = vadd.f32 %v1086_v58, %v1085_v56  ;;  %v964_v56 = vshra.s32 %v1021_v55, %v958_v22 }
 0x221   :  { %v1088_v60 = vpop.f32.mrf.mxu1 }
 0x222   :  { %v965_v50 = vand.u32 1, %v964_v56 }
 0x223   :  { %v1089_v23 = vpop.f32.mrf.mxu1 }
 0x224   :  { %v1090_v0 = vadd.f32 %v1089_v23, %v1088_v60  ;;  %vm966_vm3 = vcmp.gt.s32.totalorder %v965_v50, 0 }
 0x225   :  { %v1091_v26 = vpop.f32.mrf.mxu1 }
 0x226   :  { %v867_v37 = vadd.f32 %v1090_v0, %v1749_v14 }
 0x227   :  { %v1092_v5 = vpop.f32.mrf.mxu1 }
 0x228   :  { %v1093_v20 = vadd.f32 %v1092_v5, %v1091_v26 }
 0x229   :  { %v1094_v7 = vpop.f32.mrf.mxu1 }
 0x22a   :  { %v872_v24 = vadd.f32 %v1093_v20, %v1743_v15  ;;  %v851_v15 = vadd.f32 %v1078_v35, %v1758_v21 }
 0x22b   :  { %v1095_v4 = vpop.f32.mrf.mxu1 }
 0x22c   :  { %v1096_v62 = vadd.f32 %v1095_v4, %v1094_v7 }
 0x22d   :  { %v1097_v8 = vpop.f32.mrf.mxu1 }
 0x22e   :  { %v875_v25 = vadd.f32 %v1096_v62, %v1745_v57  ;;  %v1075_v57 = vadd.f32 %v1074_v47, %v1073_v33 }
 0x22f   :  { %v1098_v6 = vpop.f32.mrf.mxu1 }
 0x230   :  { %v1099_v11 = vadd.f32 %v1098_v6, %v1097_v8  ;;  %v848_v14 = vadd.f32 %v1075_v57, %v1756_v19 }
 0x231   :  { %v1100_v13 = vpop.f32.mrf.mxu1 }
 0x232   :  { %v880_v18 = vadd.f32 %v1099_v11, %v1739_v10  ;;  %v864_v10 = vadd.f32 %v1087_v27, %v1747_v17  ;;  %v843_v17 = vadd.f32 %v1072_v39, %v1762_v61 }
 0x233   :  { %v1101_v54 = vpop.f32.mrf.mxu1 }
 0x234   :  { %v1102_v63 = vadd.f32 %v1101_v54, %v1100_v13  ;;  %1284 = vtanh.f32 %v880_v18 }
 0x236   :  { %v883_v3 = vadd.f32 %v1102_v63, %v1741_v12  ;;  %v856_v12 = vadd.f32 %v1081_v30, %v1751_v16 }
 0x238   :  { %1286 = vtanh.f32 %v883_v3 }
 0x239   :  { %1288 = vtanh.f32 %v875_v25 }
 0x23a   :  { %1290 = vtanh.f32 %v872_v24 }
 0x23b   :  { %1292 = vtanh.f32 %v867_v37 }
 0x23c   :  { %1294 = vtanh.f32 %v864_v10 }
 0x23d   :  { %1296 = vtanh.f32 %v859_v38 }
 0x23e   :  { %1298 = vtanh.f32 %v856_v12 }
 0x23f   :  { %1300 = vtanh.f32 %v851_v15 }
 0x240   :  { %1302 = vtanh.f32 %v848_v14 }
 0x241   :  { %v1285_v29 = vpop.eup %1284  ;;  %1304 = vtanh.f32 %v843_v17 }
 0x242   :  { %1306 = vtanh.f32 %v840_v53 }
 0x245   :  { %v1287_v31 = vpop.eup %1286 }
 0x246   :  { %v910_v40 = vpack.c.bf16 %v1287_v31, %v1285_v29  ;;  %v1289_v41 = vpop.eup %1288 }
 0x247   :  { %v1291_v16 = vpop.eup %1290 }
 0x248   :  { %1147 = vmatpush3.bf16.msra.mxu0 %v910_v40  ;;  %v909_v21 = vpack.c.bf16 %v1289_v41, %v1291_v16  ;;  %v1293_v42 = vpop.eup %1292 }
 0x249   :  { %1148 = vmatprep.subr.bf16.mxu0 %v1309_v9  ;;  %v1295_v19 = vpop.eup %1294 }
 0x24a   :  { %v908_v61 = vpack.c.bf16 %v1293_v42, %v1295_v19  ;;  %v1297_v34 = vpop.eup %1296 }
 0x24b   :  { %v1299_v43 = vpop.eup %1298 }
 0x24c   :  { %1149 = vmatpush3.bf16.msra.mxu0 %v909_v21  ;;  %v907_v59 = vpack.c.bf16 %v1297_v34, %v1299_v43  ;;  %v1301_v36 = vpop.eup %1300 }
 0x24d   :  { %1150 = vmatprep.subr.bf16.mxu0 %v1309_v9  ;;  %v1303_v44 = vpop.eup %1302 }
 0x24e   :  { %v906_v33 = vpack.c.bf16 %v1301_v36, %v1303_v44  ;;  %v1305_v47 = vpop.eup %1304 }
 0x24f   :  { %v1307_v48 = vpop.eup %1306 }
 0x250   :  { %1151 = vmatpush3.bf16.msra.mxu0 %v908_v61  ;;  %v905_v49 = vpack.c.bf16 %v1305_v47, %v1307_v48 }
 0x251   :  { %1152 = vmatprep.subr.bf16.mxu0 %v1309_v9 }
 0x254   :  { %1153 = vmatpush3.bf16.msra.mxu0 %v907_v59 }
 0x255   :  { %1154 = vmatprep.subr.bf16.mxu0 %v1309_v9 }
 0x258   :  { %1155 = vmatpush3.bf16.msra.mxu0 %v906_v33 }
 0x259   :  { %1156 = vmatprep.subr.bf16.mxu0 %v1309_v9 }
 0x25c   :  { %1157 = vmatpush3.bf16.msra.mxu0 %v905_v49 }
 0x25d   :  { %1158 = vmatprep.subr.bf16.mxu0 %v1309_v9 }
 0x260   :  { %1159 = vmatpush3.bf16.msra.mxu0 %v904_v1 }
 0x261   :  { %1160 = vmatprep.subr.bf16.mxu0 %v1309_v9 }
 0x264   :  { %1161 = vmatpush3.bf16.msra.mxu0 %v903_v32 }
 0x267   :  { %1163 = vmatmul.mubr.bf16.vlgmr.msra.gmra.mxu0 %v902_v52 }
 0x327   :  { %v951_v1 = vpop.f32.mrf.mxu0 }
 0x328   :  { %v952_v9 = vadd.f32 %v951_v1, %v915_v51 }
 0x329   :  { %v1164_v58 = vpop.f32.mrf.mxu0 }
 0x32a   :  { %v967_v45 = vsel %vm966_vm3, %v952_v9, -1e+09 }
 0x32b   :  { %968 = vst [vmem:[%s1821_s8] sm:$0xff] %v967_v45  ;;  %v954_v46 = vpop.f32.mrf.mxu0 }
 0x32d   :  { %v1165_v32 = vpop.f32.mrf.mxu0 }

</bundles_post_ra>
